<compile_context>
chip_gen: v5e
topology: v5e:2x2
jax: 0.10.0
libtpu: 0.0.40
codegen_flags: <defaults>
</compile_context>

<pallas_src>
import functools
import math

import numpy as np
import jax
import jax.numpy as jnp
from jax.experimental import pallas as pl
from jax.experimental.pallas import tpu as pltpu


def _round_up(x, m):
    return ((x + m - 1) // m) * m


def _num_filters(dmin, dmax, step):
    # torch.arange(dmin, dmax + step, step): size = ceil((end - start) / step),
    # computed in double precision.
    return int(math.ceil((float(dmax) + float(step) - float(dmin)) / float(step)))


def _gaussian_distance_kernel(d_ref, centers_ref, gid_ref, o_ref, *,
                              group, neg_inv_var_sq):
    """One grid step.

    d_ref:       (tile_g, G)     f32 - G consecutive distances per grouped row.
    centers_ref: (1, G*F)        f32 - filter centers, tiled G times.
    gid_ref:     (1, G*F)        f32 - which of the G distances each lane uses.
    o_ref:       (tile_g, G*F)   row r, lane l = gaussian(d[r, l // F], c[l % F]);
                                 row-major identical to the (P, F) output.
    """
    d = d_ref[...]                      # (tile_g, G) f32
    centers = centers_ref[...]          # (1, GF)
    gid = gid_ref[...]                  # (1, GF)

    # Select, per lane, the distance of its group (G <= 8 static selects).
    d_b = jnp.where(gid == 0.0, d[:, 0:1], 0.0)
    for g in range(1, group):
        d_b = jnp.where(gid == float(g), d[:, g:g + 1], d_b)

    diff = d_b - centers                # (tile_g, GF) f32
    o_ref[...] = jnp.exp((diff * diff) * neg_inv_var_sq).astype(o_ref.dtype)


def gaussian_distance(distances, dmin, dmax, step, var=None, *,
                      tile_rows=4096, out_dtype=jnp.float32,
                      vmem_budget_bytes=24 * 1024 * 1024):
    """Pallas implementation of GaussianDistance.forward / expand."""
    assert dmin < dmax
    assert dmax - dmin > step
    if var is None:
        var = step

    num_filters = _num_filters(dmin, dmax, step)

    orig_shape = distances.shape
    flat = distances.reshape(-1).astype(jnp.float32)
    P = flat.shape[0]

    # Pack G consecutive distances per output row to densify the 128-lane axis.
    # G must divide P so the final reshape back to (P, F) is layout-free.
    max_group = max(1, min(8, 128 // num_filters)) if num_filters <= 128 else 1
    group = 1
    for g in range(max_group, 0, -1):
        if P % g == 0:
            group = g
            break
    gf = group * num_filters
    p_grp = P // group

    # VMEM-budgeted tile of grouped rows (input + output double buffers + temps).
    out_itemsize = jnp.dtype(out_dtype).itemsize
    lane_pad = _round_up(gf, 128)
    bytes_per_row = (2 * 128 * 4                      # input block (lane-padded), x2 bufs
                     + 2 * lane_pad * out_itemsize    # output block, x2 bufs
                     + 4 * lane_pad * 4)              # f32 temporaries headroom
    vmem_cap_rows = max(8, (vmem_budget_bytes // bytes_per_row) // 8 * 8)
    tile_cap = max(8, (min(int(tile_rows), vmem_cap_rows) // 8) * 8)

    if p_grp <= tile_cap:
        tile_g = p_grp                                # single full-extent block
    else:
        tile_g = tile_cap
        if pl.cdiv(p_grp, tile_g) < 4:                # keep v7x megacore fed
            tile_g = min(tile_g, max(8, _round_up(pl.cdiv(p_grp, 4), 8)))

    grid_steps = pl.cdiv(p_grp, tile_g)

    d_grp = flat.reshape(p_grp, group)
    pad_rows = grid_steps * tile_g - p_grp
    if pad_rows:
        # Pad with an in-range value so the masked-out tail never produces NaNs.
        d_grp = jnp.pad(d_grp, ((0, pad_rows), (0, 0)),
                        constant_values=float(dmin))

    # Tiny constant rows: filter centers (tiled G times) and per-lane group ids.
    centers_np = (float(dmin)
                  + float(step) * np.arange(num_filters, dtype=np.float64)
                  ).astype(np.float32)
    centers_row = jnp.asarray(np.tile(centers_np, group).reshape(1, gf))
    gid_row = jnp.asarray(
        np.repeat(np.arange(group, dtype=np.float32), num_filters).reshape(1, gf))

    kernel = functools.partial(
        _gaussian_distance_kernel,
        group=group,
        neg_inv_var_sq=-1.0 / (float(var) * float(var)),
    )

    out = pl.pallas_call(
        kernel,
        out_shape=jax.ShapeDtypeStruct((p_grp, gf), out_dtype),
        grid=(grid_steps,),
        in_specs=[
            pl.BlockSpec((tile_g, group), lambda i: (i, 0)),   # distances (grouped)
            pl.BlockSpec((1, gf), lambda i: (0, 0)),           # filter centers
            pl.BlockSpec((1, gf), lambda i: (0, 0)),           # group ids
        ],
        out_specs=pl.BlockSpec((tile_g, gf), lambda i: (i, 0)),
        compiler_params=pltpu.CompilerParams(
            dimension_semantics=("parallel",),
            vmem_limit_bytes=32 * 1024 * 1024,
        ),
        cost_estimate=pl.CostEstimate(
            flops=5 * P * num_filters,
            transcendentals=P * num_filters,
            bytes_accessed=P * 4 + P * num_filters * out_itemsize,
        ),
    )(d_grp, centers_row, gid_row)

    # (p_grp, G*F) row-major is bit-identical to (P, F) row-major: reshape is free.
    return out.reshape(*orig_shape, num_filters)


if __name__ == "__main__":
    key = jax.random.PRNGKey(0)

    dmin, dmax, step = 0.0, 8.0, 0.2                 # -> F = 41 filters
    F = _num_filters(dmin, dmax, step)
    filt = jnp.asarray(
        (dmin + step * np.arange(F, dtype=np.float64)).astype(np.float32))

    def ref(d):
        return jnp.exp(-((d[..., None] - filt) ** 2) / (step ** 2))

    k1, k2, k3 = jax.random.split(key, 3)
    cases = [
        jax.random.uniform(k1, (2, 64), jnp.float32, dmin, dmax),   # P=128 -> G=2
        jax.random.uniform(k2, (3, 37), jnp.float32, dmin, dmax),   # P=111 -> G=3
        jax.random.uniform(k3, (5, 29), jnp.float32, dmin, dmax),   # P=145 -> G=1
    ]
    for idx, d in enumerate(cases):
        out = jax.block_until_ready(gaussian_distance(d, dmin, dmax, step))
        assert out.shape == d.shape + (F,)
        assert jnp.allclose(out, ref(d), atol=1e-5, rtol=1e-5), f"mismatch case {idx}"

    # Multi-step grid, grouped rows, no padding (P=480 -> G=3, 10 grid steps).
    d_multi = jax.random.uniform(jax.random.PRNGKey(1), (2, 240), jnp.float32,
                                 minval=dmin, maxval=dmax)
    out = jax.block_until_ready(
        gaussian_distance(d_multi, dmin, dmax, step, tile_rows=16))
    assert jnp.allclose(out, ref(d_multi), atol=1e-5, rtol=1e-5)

    # Multi-step grid with ragged last block + padded input rows (P=161 -> G=1).
    d_ragged = jax.random.uniform(jax.random.PRNGKey(2), (7, 23), jnp.float32,
                                  minval=dmin, maxval=dmax)
    out = jax.block_until_ready(
        gaussian_distance(d_ragged, dmin, dmax, step, tile_rows=16))
    assert jnp.allclose(out, ref(d_ragged), atol=1e-5, rtol=1e-5)

    print("KERNEL_OK")
</pallas_src>

<mosaic_0001>
module attributes {stable_mosaic.version = 11 : i64} {
  func.func @_gaussian_distance_kernel(%arg0: i32, %arg1: memref<64x2xf32, #tpu.memory_space<vmem>>, %arg2: memref<1x82xf32, #tpu.memory_space<vmem>>, %arg3: memref<1x82xf32, #tpu.memory_space<vmem>>, %arg4: memref<64x82xf32, #tpu.memory_space<vmem>>) attributes {dimension_semantics = [#tpu.dimension_semantics<parallel>], iteration_bounds = array<i64: 1>, scalar_prefetch = 0 : i64, scratch_operands = 0 : i64, tpu.core_type = #tpu.core_type<tc>, window_params = [{transform_indices = @transform_0, window_bounds = array<i64: 64, 2>}, {pipeline_mode = #tpu.pipeline_mode<synchronous>, transform_indices = @transform_1, window_bounds = array<i64: 1, 82>}, {pipeline_mode = #tpu.pipeline_mode<synchronous>, transform_indices = @transform_2, window_bounds = array<i64: 1, 82>}, {transform_indices = @transform_3, window_bounds = array<i64: 64, 82>}]} {
    %c0 = arith.constant 0 : index
    %c0_0 = arith.constant 0 : index
    %0 = vector.load %arg1[%c0, %c0_0] : memref<64x2xf32, #tpu.memory_space<vmem>>, vector<64x2xf32>
    %c0_1 = arith.constant 0 : index
    %c0_2 = arith.constant 0 : index
    %1 = vector.load %arg2[%c0_1, %c0_2] : memref<1x82xf32, #tpu.memory_space<vmem>>, vector<1x82xf32>
    %c0_3 = arith.constant 0 : index
    %c0_4 = arith.constant 0 : index
    %2 = vector.load %arg3[%c0_3, %c0_4] : memref<1x82xf32, #tpu.memory_space<vmem>>, vector<1x82xf32>
    %cst = arith.constant 0.000000e+00 : f32
    %3 = vector.broadcast %cst : f32 to vector<1x82xf32>
    %4 = arith.cmpf oeq, %2, %3 : vector<1x82xf32>
    %5 = vector.extract_strided_slice %0 {offsets = [0, 0], sizes = [64, 1], strides = [1, 1]} : vector<64x2xf32> to vector<64x1xf32>
    %cst_5 = arith.constant 0.000000e+00 : f32
    %6 = vector.shape_cast %4 : vector<1x82xi1> to vector<1x82xi1>
    %7 = vector.broadcast %6 : vector<1x82xi1> to vector<64x82xi1>
    %8 = vector.shape_cast %5 : vector<64x1xf32> to vector<64x1xf32>
    %9 = vector.broadcast %8 : vector<64x1xf32> to vector<64x82xf32>
    %10 = vector.broadcast %cst_5 : f32 to vector<64x82xf32>
    %11 = arith.select %7, %9, %10 : vector<64x82xi1>, vector<64x82xf32>
    %cst_6 = arith.constant 1.000000e+00 : f32
    %12 = vector.broadcast %cst_6 : f32 to vector<1x82xf32>
    %13 = arith.cmpf oeq, %2, %12 : vector<1x82xf32>
    %14 = vector.extract_strided_slice %0 {offsets = [0, 1], sizes = [64, 1], strides = [1, 1]} : vector<64x2xf32> to vector<64x1xf32>
    %15 = vector.shape_cast %13 : vector<1x82xi1> to vector<1x82xi1>
    %16 = vector.broadcast %15 : vector<1x82xi1> to vector<64x82xi1>
    %17 = vector.shape_cast %14 : vector<64x1xf32> to vector<64x1xf32>
    %18 = vector.broadcast %17 : vector<64x1xf32> to vector<64x82xf32>
    %19 = arith.select %16, %18, %11 : vector<64x82xi1>, vector<64x82xf32>
    %20 = vector.broadcast %1 : vector<1x82xf32> to vector<64x82xf32>
    %21 = arith.subf %19, %20 : vector<64x82xf32>
    %22 = arith.mulf %21, %21 : vector<64x82xf32>
    %cst_7 = arith.constant -2.500000e+01 : f32
    %23 = vector.broadcast %cst_7 : f32 to vector<64x82xf32>
    %24 = arith.mulf %22, %23 : vector<64x82xf32>
    %25 = math.exp %24 : vector<64x82xf32>
    %c0_8 = arith.constant 0 : index
    %c0_9 = arith.constant 0 : index
    %26 = vector.load %arg4[%c0_8, %c0_9] : memref<64x82xf32, #tpu.memory_space<vmem>>, vector<64x82xf32>
    tpu.vector_store %arg4[%c0_8, %c0_9], %25 {strides = array<i32>} : memref<64x82xf32, #tpu.memory_space<vmem>>, vector<64x82xf32>,
    return
  }
  func.func @transform_0(%arg0: i32) -> (i32, i32) {
    %c0_i32 = arith.constant 0 : i32
    %c0_i32_0 = arith.constant 0 : i32
    return %arg0, %c0_i32 : i32, i32
  }
  func.func @transform_1(%arg0: i32) -> (i32, i32) {
    %c0_i32 = arith.constant 0 : i32
    %c0_i32_0 = arith.constant 0 : i32
    %c0_i32_1 = arith.constant 0 : i32
    return %c0_i32, %c0_i32_0 : i32, i32
  }
  func.func @transform_2(%arg0: i32) -> (i32, i32) {
    %c0_i32 = arith.constant 0 : i32
    %c0_i32_0 = arith.constant 0 : i32
    %c0_i32_1 = arith.constant 0 : i32
    return %c0_i32, %c0_i32_0 : i32, i32
  }
  func.func @transform_3(%arg0: i32) -> (i32, i32) {
    %c0_i32 = arith.constant 0 : i32
    %c0_i32_0 = arith.constant 0 : i32
    return %arg0, %c0_i32 : i32, i32
  }
}

</mosaic_0001>

<bundles_post_ra>
// kernel: tpu_custom_call.1
= control target key start
LH: loop header
LB: loop body
LE: loop exit
PB: predicated region body
PF: predicated region fallthrough
CT: control target
= control target key end

     0   :  { %v245_v2 = vmov 0   ;;  %s364_s0 = inlined_call_operand.vmem [shape: f32[64,2], index: 0, kind: input, shape index: {}]   ;;  %s365_s1 = inlined_call_operand.vmem [shape: f32[1,82], index: 1, kind: input, shape index: {}]   ;;  %s366_s2 = inlined_call_operand.vmem [shape: f32[1,82], index: 2, kind: input, shape index: {}]   ;;  %s367_s3 = inlined_call_operand.hbm [shape: f32[64,82], index: 3, kind: output, shape index: {}]  }
   0x1   :  { %v19_v0 = vld [vmem:[%s364_s0 + $0x20] sm:$0xff]  ;;  %v17_v1 = vld [vmem:[%s364_s0 + $0x10] sm:$0xff]  ;;  %198 = vset.pattern.permute.xlu2 %v245_v2  ;;  %197 = vset.pattern.permute.xlu1 %v245_v2 }
   0x2   :  { %v15_v3 = vld [vmem:[%s364_s0] sm:$0xff]  ;;  %196 = vset.pattern.permute.xlu0 %v245_v2  ;;  %51 = vperm.xlu2 %198, %v19_v0  }
   0x3   :  { %41 = vperm.xlu1 %197, %v17_v1   ;;  %31 = vperm.xlu0 %196, %v15_v3  }
   0x4   :  { %8 = vsyncpa [#allocation3], 0  ;;  %v20_v4 = vld [vmem:[%s364_s0 + $0x28] sm:$0xff]  ;;  %v18_v5 = vld [vmem:[%s364_s0 + $0x18] sm:$0xff]  ;;  %v246_v9 = vmov 1   ;;  %vm164_vm4 = vcmask 670720  }
   0x5   :  { %v16_v6 = vld [vmem:[%s364_s0 + $0x8] sm:$0xff]  ;;  %v22_v7 = vld [vmem:[%s364_s0 + $0x38] sm:$0xff]  ;;  %v21_v8 = vld [vmem:[%s364_s0 + $0x30] sm:$0xff]  ;;  %s179_s6 = sshll.u32 %s367_s3, 4  ;;  %s248_s7 = smov 128   ;;  %s180_s6 = int_to_ptr.hbm [resolvable:$true] %s179_s6 }
   0x6   :  { %v24_v12 = vld [vmem:[%s366_s2] sm:$0x1]  ;;  %s249_s8 = smov 8  }
   0x7   :  { %vm77_vm0 = vcmp.eq.f32.partialorder %v24_v12, 1.0  ;;  %vm25_vm1 = vcmp.eq.f32.partialorder %v24_v12, 0.0  ;;  %v306_v19 = vld [vmem:[%s365_s1] ss:$0 sm:$0xff]  ;;  %s247_s1 = smov [#allocation2]  }
   0x8   :  { %v78_v13 = vsel %vm77_vm0, 1, %v245_v2  ;;  %v26_v14 = vsel %vm25_vm1, 1, %v245_v2  ;;  %s177_s2 = sshll.u32 %s247_s1, 4  ;;  %s178_s2 = int_to_ptr.vmem [resolvable:$true] %s177_s2 }
   0x9   :  { %v79_v16 = vperm.slane %v78_v13, 0  ;;  %v27_v17 = vperm.slane %v26_v14, 0 }
   0xa   :  { %56 = vperm.xlu2 %198, %v20_v4  }
   0xb   :  { %46 = vperm.xlu1 %197, %v18_v5   ;;  %36 = vperm.xlu0 %196, %v16_v6   ;;  %vm299_vm2 = vcmp.eq.s32.totalorder %v79_v16, 1  ;;  %vm308_vm3 = vcmp.eq.s32.totalorder %v27_v17, 1 }
  0x12   :  { %199 = vset.pattern.permute.xlu2 %v246_v9 }
  0x13   :  { %66 = vperm.xlu1 %197, %v22_v7   ;;  %61 = vperm.xlu0 %196, %v21_v8  }
  0x14   :  { %82 = vperm.xlu2 %199, %v15_v3  }
  0x1b   :  { %201 = vset.pattern.permute.xlu1 %v246_v9  ;;  %200 = vset.pattern.permute.xlu0 %v246_v9 }
  0x1c   :  { %90 = vperm.xlu1 %201, %v17_v1   ;;  %94 = vperm.xlu2 %199, %v18_v5  }
  0x1d   :  { %86 = vperm.xlu0 %200, %v16_v6  }
  0x24   :  { %98 = vperm.xlu1 %201, %v19_v0   ;;  %102 = vperm.xlu2 %199, %v20_v4  }
  0x25   :  { %106 = vperm.xlu0 %200, %v21_v8  }
  0x2c   :  { %110 = vperm.xlu1 %201, %v22_v7  }
  0x5c   :  { %v294_v10 = vpop.permute.xlu2 %51 }
  0x5d   :  { %v73_v62 = vsel %vm308_vm3, %v294_v10, 0.0 }
  0x64   :  { %v57_v11 = vpop.permute.xlu2 %56 }
  0x65   :  { %v74_v28 = vsel %vm308_vm3, %v57_v11, 0.0 }
  0x6e   :  { %v83_v15 = vpop.permute.xlu2 %82 }
  0x75   :  { %v42_v21 = vpop.permute.xlu1 %41  ;;  %v32_v22 = vpop.permute.xlu0 %31 }
  0x76   :  { %v69_v23 = vsel %vm308_vm3, %v32_v22, 0.0  ;;  %v95_v24 = vpop.permute.xlu2 %94  ;;  %v71_v49 = vsel %vm308_vm3, %v42_v21, 0.0 }
  0x77   :  { %v113_v25 = vsel %vm299_vm2, %v83_v15, %v69_v23 }
  0x78   :  { %v124_v26 = vsub.f32 %v113_v25, %v306_v19 }
  0x7a   :  { %v132_v27 = vmul.f32 %v124_v26, %v124_v26 }
  0x7c   :  { %v140_v29 = vmul.f32 -25.0, %v132_v27 }
  0x7d   :  { %v47_v30 = vpop.permute.xlu1 %46  ;;  %v37_v31 = vpop.permute.xlu0 %36 }
  0x7e   :  { %v148_v32 = vmul.f32 1.442695, %v140_v29  ;;  %v72_v33 = vsel %vm308_vm3, %v47_v30, 0.0  ;;  %v103_v34 = vpop.permute.xlu2 %102  ;;  %v70_v52 = vsel %vm308_vm3, %v37_v31, 0.0 }
  0x7f   :  { %v116_v35 = vsel %vm299_vm2, %v95_v24, %v72_v33  ;;  %v118_v36 = vsel %vm299_vm2, %v103_v34, %v74_v28 }
  0x80   :  { %203 = vpow2.f32 %v148_v32  ;;  %v127_v37 = vsub.f32 %v116_v35, %v306_v19  ;;  %v129_v38 = vsub.f32 %v118_v36, %v306_v19 }
  0x82   :  { %v135_v39 = vmul.f32 %v127_v37, %v127_v37  ;;  %v137_v40 = vmul.f32 %v129_v38, %v129_v38 }
  0x84   :  { %v143_v41 = vmul.f32 -25.0, %v135_v39  ;;  %v145_v42 = vmul.f32 -25.0, %v137_v40 }
  0x85   :  { %v67_v43 = vpop.permute.xlu1 %66  ;;  %v62_v44 = vpop.permute.xlu0 %61 }
  0x86   :  { %v204_v45 = vpop.eup %203  ;;  %v154_v46 = vmul.f32 1.442695, %v143_v41  ;;  %v158_v47 = vmul.f32 1.442695, %v145_v42  ;;  %v75_v1 = vsel %vm308_vm3, %v62_v44, 0.0  ;;  %v76_v13 = vsel %vm308_vm3, %v67_v43, 0.0 }
  0x87   :  { %165 = vst.msk [vmem:[#allocation2] sm:$0xff] %vm164_vm4, %v204_v45 }
  0x88   :  { %205 = vpow2.f32 %v154_v46 }
  0x89   :  { %207 = vpow2.f32 %v158_v47 }
  0x8e   :  { %v206_v48 = vpop.eup %205  ;;  %v91_v50 = vpop.permute.xlu1 %90 }
  0x8f   :  { %v208_v51 = vpop.eup %207  ;;  %168 = vst.msk [vmem:[#allocation2 + $0x18] sm:$0xff] %vm164_vm4, %v206_v48  ;;  %v115_v53 = vsel %vm299_vm2, %v91_v50, %v71_v49  ;;  %v87_v54 = vpop.permute.xlu0 %86 }
  0x90   :  { %170 = vst.msk [vmem:[#allocation2 + $0x28] sm:$0xff] %vm164_vm4, %v208_v51  ;;  %v126_v55 = vsub.f32 %v115_v53, %v306_v19  ;;  %v114_v56 = vsel %vm299_vm2, %v87_v54, %v70_v52 }
  0x91   :  { %v125_v57 = vsub.f32 %v114_v56, %v306_v19 }
  0x92   :  { %v134_v58 = vmul.f32 %v126_v55, %v126_v55 }
  0x93   :  { %v133_v59 = vmul.f32 %v125_v57, %v125_v57 }
  0x94   :  { %v142_v60 = vmul.f32 -25.0, %v134_v58 }
  0x95   :  { %v141_v61 = vmul.f32 -25.0, %v133_v59 }
  0x96   :  { %v152_v63 = vmul.f32 1.442695, %v142_v60  ;;  %v99_v0 = vpop.permute.xlu1 %98 }
  0x97   :  { %v150_v2 = vmul.f32 1.442695, %v141_v61  ;;  %v117_v3 = vsel %vm299_vm2, %v99_v0, %v73_v62  ;;  %v107_v4 = vpop.permute.xlu0 %106 }
  0x98   :  { %209 = vpow2.f32 %v152_v63  ;;  %v128_v5 = vsub.f32 %v117_v3, %v306_v19  ;;  %v119_v6 = vsel %vm299_vm2, %v107_v4, %v75_v1 }
  0x99   :  { %211 = vpow2.f32 %v150_v2  ;;  %v130_v7 = vsub.f32 %v119_v6, %v306_v19 }
  0x9a   :  { %v136_v8 = vmul.f32 %v128_v5, %v128_v5 }
  0x9b   :  { %v138_v9 = vmul.f32 %v130_v7, %v130_v7 }
  0x9c   :  { %v144_v10 = vmul.f32 -25.0, %v136_v8 }
  0x9d   :  { %v146_v11 = vmul.f32 -25.0, %v138_v9 }
  0x9e   :  { %v210_v12 = vpop.eup %209  ;;  %v156_v14 = vmul.f32 1.442695, %v144_v10  ;;  %v111_v15 = vpop.permute.xlu1 %110 }
  0x9f   :  { %v212_v16 = vpop.eup %211  ;;  %167 = vst.msk [vmem:[#allocation2 + $0x10] sm:$0xff] %vm164_vm4, %v210_v12  ;;  %v160_v17 = vmul.f32 1.442695, %v146_v11  ;;  %v120_v21 = vsel %vm299_vm2, %v111_v15, %v76_v13 }
  0xa0   :  { %166 = vst.msk [vmem:[#allocation2 + $0x8] sm:$0xff] %vm164_vm4, %v212_v16  ;;  %213 = vpow2.f32 %v156_v14  ;;  %v131_v22 = vsub.f32 %v120_v21, %v306_v19 }
  0xa1   :  { %215 = vpow2.f32 %v160_v17 }
  0xa2   :  { %v139_v23 = vmul.f32 %v131_v22, %v131_v22 }
  0xa4   :  { %v147_v24 = vmul.f32 -25.0, %v139_v23 }
  0xa6   :  { %v214_v25 = vpop.eup %213  ;;  %v162_v20 = vmul.f32 1.442695, %v147_v24 }
  0xa7   :  { %v216_v26 = vpop.eup %215  ;;  %169 = vst.msk [vmem:[#allocation2 + $0x20] sm:$0xff] %vm164_vm4, %v214_v25 }
  0xa8   :  { %171 = vst.msk [vmem:[#allocation2 + $0x30] sm:$0xff] %vm164_vm4, %v216_v26  ;;  %217 = vpow2.f32 %v162_v20 }
  0xae   :  { %v218_v18 = vpop.eup %217 }
  0xaf   :  { %172 = vst.msk [vmem:[#allocation2 + $0x38] sm:$0xff] %vm164_vm4, %v218_v18 }
  0xb0   :  { %185 = dma.vmem_to_hbm [thread:$0]  %s178_s2, 1024, %s180_s6, [#allocation3], %s248_s7, %s248_s7, %s249_s8  }
  0xb1   :  { %243 = dma.done.wait [#allocation3], 1024  }
  0xb2   :  { %244 = vsyncadd [#allocation3], 4294966272 }
  0xb3   :  { %190 = vsyncpa [#allocation3], 1 }

</bundles_post_ra>
